<compile_context>
chip_gen: v6e
topology: v6e:2x2x1
jax: 0.10.0
libtpu: 0.0.40
codegen_flags: <defaults>
</compile_context>

<pallas_src>
import functools

import jax
import jax.numpy as jnp
from jax.experimental import pallas as pl
from jax.experimental.pallas import tpu as pltpu

EPS = 1e-3


def _vmem_limit_bytes():
    """Scoped-VMEM limit derived from the chip (v5e/v6e: 128 MiB phys, v7x: 64 MiB)."""
    cap = None
    try:
        cap = getattr(pltpu.get_tpu_info(), "vmem_capacity_bytes", None)
    except Exception:
        cap = None
    if not cap:
        cap = 64 * 1024 * 1024  # conservative fallback (= v7x physical per-TC)
    return int(min(cap * 3 // 4, 100 * 1024 * 1024))


# ----------------------------- fused (small) path -----------------------------

def _bn_fused_kernel(x_ref, gamma_ref, beta_ref, o_ref, *, inv_count):
    # x_ref: [N, C, L]; gamma_ref / beta_ref: [C, 1].
    x = x_ref[...].astype(jnp.float32)
    # One-pass statistics: batch-dim sums are VPU adds; the single cross-lane
    # (XLU) reduction happens once on the [C, L] partial.
    s = jnp.sum(jnp.sum(x, axis=0), axis=1, keepdims=True)        # [C, 1]
    sq = jnp.sum(jnp.sum(x * x, axis=0), axis=1, keepdims=True)   # [C, 1]
    mean = s * inv_count
    var = jnp.maximum(sq * inv_count - mean * mean, 0.0)
    inv_std = jax.lax.rsqrt(var + EPS)
    # Fold affine into per-channel scale/shift: y = x * scale + shift.
    scale = inv_std * gamma_ref[...]                               # [C, 1]
    shift = beta_ref[...] - mean * scale                           # [C, 1]
    o_ref[...] = (x * scale[None] + shift[None]).astype(o_ref.dtype)


def _bn_fused(x3d, gamma2d, beta2d, vmem_limit):
    n, c, l = x3d.shape
    kernel = functools.partial(_bn_fused_kernel, inv_count=1.0 / (n * l))
    x_bytes = int(x3d.size) * x3d.dtype.itemsize
    return pl.pallas_call(
        kernel,
        out_shape=jax.ShapeDtypeStruct((n, c, l), x3d.dtype),
        grid=(1,),
        in_specs=[
            pl.BlockSpec((n, c, l), lambda i: (0, 0, 0)),
            pl.BlockSpec((c, 1), lambda i: (0, 0)),
            pl.BlockSpec((c, 1), lambda i: (0, 0)),
        ],
        out_specs=pl.BlockSpec((n, c, l), lambda i: (0, 0, 0)),
        compiler_params=pltpu.CompilerParams(
            dimension_semantics=("arbitrary",), vmem_limit_bytes=vmem_limit),
        cost_estimate=pl.CostEstimate(
            flops=7 * n * c * l, transcendentals=c,
            bytes_accessed=2 * x_bytes + 4 * c * 4),
    )(x3d, gamma2d, beta2d)


# ------------------------------ tiled (large) path -----------------------------

def _pick_tiles(n, c, l, block_budget_bytes):
    """Pick (n_tile, l_tile): the largest f32 block under the budget.

    Candidates keep the lane dim either a 128-multiple divisor of L or the full
    extent; ties prefer the widest lane dim (lane-dense stores).
    """
    itemsize = 4
    if l % 128 == 0:
        l_cands = [d for d in range(l, 0, -128) if l % d == 0]
    else:
        # Non-128-aligned spatial extent: only the full extent is a legal block
        # lane dim.  (Zero-padding to 128 would add a full extra HBM read+write
        # of x, which costs more than the masked-store penalty here.)
        l_cands = [l]
    n_cands = [d for d in range(n, 0, -1) if n % d == 0]
    best = (1, l_cands[-1])
    best_bytes = 0
    for lt in l_cands:                 # widest lane dim first
        for nt in n_cands:             # tallest batch slab that still fits
            b = nt * c * lt * itemsize
            if b <= block_budget_bytes:
                if b > best_bytes:
                    best, best_bytes = (nt, lt), b
                break
    return best


def _bn_stats_kernel(x_ref, psum_ref, psq_ref, sum_acc, sq_acc):
    ni = pl.program_id(1)
    li = pl.program_id(2)

    @pl.when((ni == 0) & (li == 0))
    def _init():
        sum_acc[...] = jnp.zeros_like(sum_acc)
        sq_acc[...] = jnp.zeros_like(sq_acc)

    x = x_ref[...].astype(jnp.float32)           # [n_tile, C, l_tile]
    # Lane-wide accumulation: pure VPU adds in the hot loop (no XLU per step).
    sum_acc[...] += jnp.sum(x, axis=0)           # [C, l_tile]
    sq_acc[...] += jnp.sum(x * x, axis=0)        # [C, l_tile]

    @pl.when((ni == pl.num_programs(1) - 1) & (li == pl.num_programs(2) - 1))
    def _finalize():
        # Cross-lane (XLU) reduction only once per shard.
        psum_ref[...] = jnp.sum(sum_acc[...], axis=1, keepdims=True)[None]
        psq_ref[...] = jnp.sum(sq_acc[...], axis=1, keepdims=True)[None]


def _bn_apply_kernel(x_ref, scale_ref, shift_ref, o_ref):
    x = x_ref[...].astype(jnp.float32)                     # [n_tile, C, l_tile]
    y = x * scale_ref[...][None] + shift_ref[...][None]    # per-channel scale/shift
    o_ref[...] = y.astype(o_ref.dtype)


def _bn_tiled(x3d, gamma2d, beta2d, vmem_limit, *, n_tile=None, l_tile=None):
    n, c, l = x3d.shape
    # Per-block budget: pass 2 needs 2 input + 2 output buffers, pass 1 needs
    # 2 input buffers + 2 lane-wide accumulators -> keep each block <= limit/6.
    block_budget = max(vmem_limit // 6, c * 128 * 4)
    auto_nt, auto_lt = _pick_tiles(n, c, l, block_budget)
    if n_tile is None:
        n_tile = auto_nt
    if l_tile is None:
        l_tile = auto_lt
    assert n % n_tile == 0 and l % l_tile == 0
    assert l_tile == l or l_tile % 128 == 0
    num_n_tiles = n // n_tile
    num_l_tiles = l // l_tile
    # Split the L-tile reduction into 2 independent shards so the stats pass can
    # use both TensorCores on v7x (leading "parallel" axis, per-shard partials);
    # on single-core v5e/v6e the extra axis just serializes (negligible).
    num_shards = 2 if num_l_tiles % 2 == 0 else 1
    lps = num_l_tiles // num_shards

    x_bytes = int(x3d.size) * x3d.dtype.itemsize
    inv_count = 1.0 / (n * l)

    # Pass 1: per-shard partial sums / sums-of-squares, shape [num_shards, C, 1].
    psum, psq = pl.pallas_call(
        _bn_stats_kernel,
        out_shape=(jax.ShapeDtypeStruct((num_shards, c, 1), jnp.float32),
                   jax.ShapeDtypeStruct((num_shards, c, 1), jnp.float32)),
        grid=(num_shards, num_n_tiles, lps),
        in_specs=[pl.BlockSpec((n_tile, c, l_tile),
                               lambda s, i, j: (i, 0, s * lps + j))],
        out_specs=(pl.BlockSpec((1, c, 1), lambda s, i, j: (s, 0, 0)),
                   pl.BlockSpec((1, c, 1), lambda s, i, j: (s, 0, 0))),
        scratch_shapes=[pltpu.VMEM((c, l_tile), jnp.float32),
                        pltpu.VMEM((c, l_tile), jnp.float32)],
        compiler_params=pltpu.CompilerParams(
            dimension_semantics=("parallel", "arbitrary", "arbitrary"),
            vmem_limit_bytes=vmem_limit),
        cost_estimate=pl.CostEstimate(
            flops=3 * n * c * l, transcendentals=0, bytes_accessed=x_bytes),
    )(x3d)

    # Tiny [C,1] epilogue (XLA): combine shard partials, fold affine into a
    # per-channel scale/shift.  Negligible next to the two x passes.
    total_sum = jnp.sum(psum, axis=0)                      # [C, 1]
    total_sq = jnp.sum(psq, axis=0)                        # [C, 1]
    mean = total_sum * inv_count
    var = jnp.maximum(total_sq * inv_count - mean * mean, 0.0)
    inv_std = jax.lax.rsqrt(var + EPS)
    scale2d = inv_std * gamma2d
    shift2d = beta2d - mean * scale2d

    # Pass 2: y = x * scale + shift; both axes "parallel" (megacore on v7x).
    y3d = pl.pallas_call(
        _bn_apply_kernel,
        out_shape=jax.ShapeDtypeStruct((n, c, l), x3d.dtype),
        grid=(num_n_tiles, num_l_tiles),
        in_specs=[
            pl.BlockSpec((n_tile, c, l_tile), lambda i, j: (i, 0, j)),
            pl.BlockSpec((c, 1), lambda i, j: (0, 0)),
            pl.BlockSpec((c, 1), lambda i, j: (0, 0)),
        ],
        out_specs=pl.BlockSpec((n_tile, c, l_tile), lambda i, j: (i, 0, j)),
        compiler_params=pltpu.CompilerParams(
            dimension_semantics=("parallel", "parallel"),
            vmem_limit_bytes=vmem_limit),
        cost_estimate=pl.CostEstimate(
            flops=2 * n * c * l, transcendentals=0, bytes_accessed=2 * x_bytes),
    )(x3d, scale2d, shift2d)
    return y3d


# ---------------------------------- wrapper ------------------------------------

def batchnorm2d(x, gamma, beta, *, force_tiled=False, n_tile=None, l_tile=None):
    """x: [N, C, H, W] float32; gamma, beta: [C] float32."""
    n, c, h, w = x.shape
    l = h * w
    x3d = x.reshape(n, c, l)                   # free reshape — no transpose
    gamma2d = gamma.reshape(c, 1).astype(jnp.float32)
    beta2d = beta.reshape(c, 1).astype(jnp.float32)

    vmem_limit = _vmem_limit_bytes()
    x_bytes = int(x3d.size) * x3d.dtype.itemsize
    # Fused single-pass path (2x HBM traffic vs 3x for two-pass) whenever the
    # double-buffered x + out blocks fit under the chip's VMEM budget.
    fused_ok = x_bytes <= vmem_limit // 5
    if fused_ok and not force_tiled:
        y3d = _bn_fused(x3d, gamma2d, beta2d, vmem_limit)
    else:
        y3d = _bn_tiled(x3d, gamma2d, beta2d, vmem_limit,
                        n_tile=n_tile, l_tile=l_tile)
    return y3d.reshape(n, c, h, w)


def reference_batchnorm2d(x, gamma, beta):
    mean = jnp.mean(x, axis=(0, 2, 3), keepdims=True)
    var = jnp.mean((x - mean) ** 2, axis=(0, 2, 3), keepdims=True)
    return ((x - mean) / jnp.sqrt(var + EPS) * gamma.reshape(1, -1, 1, 1)
            + beta.reshape(1, -1, 1, 1))


if __name__ == "__main__":
    k_x, k_x2, k_x3, k_g, k_b = jax.random.split(jax.random.PRNGKey(0), 5)

    # 1) The module's example shape [1, 40, 14, 14] (fused single-block path),
    #    with the module's affine init (weight=1, bias=0).
    N, C, H, W = 1, 40, 14, 14
    x = jax.random.normal(k_x, (N, C, H, W), dtype=jnp.float32)
    gamma = jnp.ones((C,), dtype=jnp.float32)
    beta = jnp.zeros((C,), dtype=jnp.float32)

    y = batchnorm2d(x, gamma, beta)
    jax.block_until_ready(y)
    y_ref = reference_batchnorm2d(x, gamma, beta)
    assert y.shape == (N, C, H, W)
    assert jnp.allclose(y, y_ref, atol=1e-4, rtol=1e-4), "fused path mismatch"

    # 2) Tiled path, 128-aligned L, non-trivial affine, forced small tiles so the
    #    full machinery runs: stats grid (2 shards, 2 n-tiles, 2 l-tiles/shard),
    #    apply grid (2, 4).
    N2, C2, H2, W2 = 4, 40, 16, 32
    x2 = 2.0 * jax.random.normal(k_x2, (N2, C2, H2, W2), dtype=jnp.float32) + 0.5
    gamma2 = jax.random.normal(k_g, (C2,), dtype=jnp.float32)
    beta2 = jax.random.normal(k_b, (C2,), dtype=jnp.float32)

    y2 = batchnorm2d(x2, gamma2, beta2, force_tiled=True, n_tile=2, l_tile=128)
    jax.block_until_ready(y2)
    y2_ref = reference_batchnorm2d(x2, gamma2, beta2)
    assert y2.shape == (N2, C2, H2, W2)
    assert jnp.allclose(y2, y2_ref, atol=1e-4, rtol=1e-4), "tiled path mismatch"

    # 3) Tiled path with a non-128-aligned spatial extent (L = 196 -> full-L
    #    blocks, N tiled), exercising the masked-store / N-accumulation route.
    N3, C3, H3, W3 = 4, 40, 14, 14
    x3 = jax.random.normal(k_x3, (N3, C3, H3, W3), dtype=jnp.float32) - 0.25
    y3 = batchnorm2d(x3, gamma2, beta2, force_tiled=True, n_tile=2)
    jax.block_until_ready(y3)
    y3_ref = reference_batchnorm2d(x3, gamma2, beta2)
    assert y3.shape == (N3, C3, H3, W3)
    assert jnp.allclose(y3, y3_ref, atol=1e-4, rtol=1e-4), "unaligned-L path mismatch"

    print("KERNEL_OK")
</pallas_src>

<mosaic_0001>
module attributes {stable_mosaic.version = 11 : i64} {
  func.func @_bn_fused_kernel(%arg0: i32, %arg1: memref<1x40x196xf32, #tpu.memory_space<vmem>>, %arg2: memref<40x1xf32, #tpu.memory_space<vmem>>, %arg3: memref<40x1xf32, #tpu.memory_space<vmem>>, %arg4: memref<1x40x196xf32, #tpu.memory_space<vmem>>) attributes {dimension_semantics = [#tpu.dimension_semantics<arbitrary>], iteration_bounds = array<i64: 1>, scalar_prefetch = 0 : i64, scratch_operands = 0 : i64, tpu.core_type = #tpu.core_type<tc>, window_params = [{pipeline_mode = #tpu.pipeline_mode<synchronous>, transform_indices = @transform_0, window_bounds = array<i64: 1, 40, 196>}, {pipeline_mode = #tpu.pipeline_mode<synchronous>, transform_indices = @transform_1, window_bounds = array<i64: 40, 1>}, {pipeline_mode = #tpu.pipeline_mode<synchronous>, transform_indices = @transform_2, window_bounds = array<i64: 40, 1>}, {pipeline_mode = #tpu.pipeline_mode<synchronous>, transform_indices = @transform_3, window_bounds = array<i64: 1, 40, 196>}]} {
    %c0 = arith.constant 0 : index
    %c0_0 = arith.constant 0 : index
    %c0_1 = arith.constant 0 : index
    %0 = vector.load %arg1[%c0, %c0_0, %c0_1] : memref<1x40x196xf32, #tpu.memory_space<vmem>>, vector<1x40x196xf32>
    %cst = arith.constant dense<0.000000e+00> : vector<40x196xf32>
    %1 = vector.multi_reduction <add>, %0, %cst [0] : vector<1x40x196xf32> to vector<40x196xf32>
    %cst_2 = arith.constant dense<0.000000e+00> : vector<40xf32>
    %2 = vector.multi_reduction <add>, %1, %cst_2 [1] : vector<40x196xf32> to vector<40xf32>
    %3 = vector.shape_cast %2 : vector<40xf32> to vector<40x1xf32>
    %4 = arith.mulf %0, %0 : vector<1x40x196xf32>
    %cst_3 = arith.constant dense<0.000000e+00> : vector<40x196xf32>
    %5 = vector.multi_reduction <add>, %4, %cst_3 [0] : vector<1x40x196xf32> to vector<40x196xf32>
    %cst_4 = arith.constant dense<0.000000e+00> : vector<40xf32>
    %6 = vector.multi_reduction <add>, %5, %cst_4 [1] : vector<40x196xf32> to vector<40xf32>
    %7 = vector.shape_cast %6 : vector<40xf32> to vector<40x1xf32>
    %cst_5 = arith.constant 0.00510204071 : f32
    %8 = vector.broadcast %cst_5 : f32 to vector<40x1xf32>
    %9 = arith.mulf %3, %8 : vector<40x1xf32>
    %cst_6 = arith.constant 0.00510204071 : f32
    %10 = vector.broadcast %cst_6 : f32 to vector<40x1xf32>
    %11 = arith.mulf %7, %10 : vector<40x1xf32>
    %12 = arith.mulf %9, %9 : vector<40x1xf32>
    %13 = arith.subf %11, %12 : vector<40x1xf32>
    %cst_7 = arith.constant 0.000000e+00 : f32
    %14 = vector.broadcast %cst_7 : f32 to vector<40x1xf32>
    %15 = arith.maximumf %13, %14 : vector<40x1xf32>
    %cst_8 = arith.constant 1.000000e-03 : f32
    %16 = vector.broadcast %cst_8 : f32 to vector<40x1xf32>
    %17 = arith.addf %15, %16 : vector<40x1xf32>
    %18 = math.rsqrt %17 : vector<40x1xf32>
    %c0_9 = arith.constant 0 : index
    %c0_10 = arith.constant 0 : index
    %19 = vector.load %arg2[%c0_9, %c0_10] : memref<40x1xf32, #tpu.memory_space<vmem>>, vector<40x1xf32>
    %20 = arith.mulf %18, %19 : vector<40x1xf32>
    %c0_11 = arith.constant 0 : index
    %c0_12 = arith.constant 0 : index
    %21 = vector.load %arg3[%c0_11, %c0_12] : memref<40x1xf32, #tpu.memory_space<vmem>>, vector<40x1xf32>
    %22 = arith.mulf %9, %20 : vector<40x1xf32>
    %23 = arith.subf %21, %22 : vector<40x1xf32>
    %24 = vector.shape_cast %20 : vector<40x1xf32> to vector<1x40x1xf32>
    %25 = vector.broadcast %24 : vector<1x40x1xf32> to vector<1x40x196xf32>
    %26 = arith.mulf %0, %25 : vector<1x40x196xf32>
    %27 = vector.shape_cast %23 : vector<40x1xf32> to vector<1x40x1xf32>
    %28 = vector.broadcast %27 : vector<1x40x1xf32> to vector<1x40x196xf32>
    %29 = arith.addf %26, %28 : vector<1x40x196xf32>
    %c0_13 = arith.constant 0 : index
    %c0_14 = arith.constant 0 : index
    %c0_15 = arith.constant 0 : index
    %30 = vector.load %arg4[%c0_13, %c0_14, %c0_15] : memref<1x40x196xf32, #tpu.memory_space<vmem>>, vector<1x40x196xf32>
    tpu.vector_store %arg4[%c0_13, %c0_14, %c0_15], %29 {strides = array<i32>} : memref<1x40x196xf32, #tpu.memory_space<vmem>>, vector<1x40x196xf32>,
    return
  }
  func.func @transform_0(%arg0: i32) -> (i32, i32, i32) {
    %c0_i32 = arith.constant 0 : i32
    %c0_i32_0 = arith.constant 0 : i32
    %c0_i32_1 = arith.constant 0 : i32
    %c0_i32_2 = arith.constant 0 : i32
    return %c0_i32, %c0_i32_0, %c0_i32_1 : i32, i32, i32
  }
  func.func @transform_1(%arg0: i32) -> (i32, i32) {
    %c0_i32 = arith.constant 0 : i32
    %c0_i32_0 = arith.constant 0 : i32
    %c0_i32_1 = arith.constant 0 : i32
    return %c0_i32, %c0_i32_0 : i32, i32
  }
  func.func @transform_2(%arg0: i32) -> (i32, i32) {
    %c0_i32 = arith.constant 0 : i32
    %c0_i32_0 = arith.constant 0 : i32
    %c0_i32_1 = arith.constant 0 : i32
    return %c0_i32, %c0_i32_0 : i32, i32
  }
  func.func @transform_3(%arg0: i32) -> (i32, i32, i32) {
    %c0_i32 = arith.constant 0 : i32
    %c0_i32_0 = arith.constant 0 : i32
    %c0_i32_1 = arith.constant 0 : i32
    %c0_i32_2 = arith.constant 0 : i32
    return %c0_i32, %c0_i32_0, %c0_i32_1 : i32, i32, i32
  }
}

</mosaic_0001>

<bundles_post_ra>
// kernel: tpu_custom_call.1
= control target key start
LH: loop header
LB: loop body
LE: loop exit
PB: predicated region body
PF: predicated region fallthrough
CT: control target
= control target key end

     0   :  { %vm35_vm0 = vcmask 556032   ;;  %s462_s0 = inlined_call_operand.vmem [shape: f32[1,40,196], index: 0, kind: input, shape index: {}]   ;;  %s463_s1 = inlined_call_operand.vmem [shape: f32[40,1], index: 1, kind: input, shape index: {}]   ;;  %s464_s2 = inlined_call_operand.vmem [shape: f32[40,1], index: 2, kind: input, shape index: {}]   ;;  %s465_s3 = inlined_call_operand.hbm [shape: f32[1,40,196], index: 3, kind: output, shape index: {}]  }
   0x1   :  { %v317_v0 = vld [vmem:[%s462_s0 + $0x20] sm:$0xff]  ;;  %v322_v1 = vld [vmem:[%s462_s0 + $0x28] sm:$0xff]  ;;  %v339_v5 = vld [vmem:[%s462_s0 + $0x30] sm:$0xff] }
   0x2   :  { %v327_v2 = vld [vmem:[%s462_s0] sm:$0xff]  ;;  %v44_v3 = vsel %vm35_vm0, %v322_v1, 0.0  ;;  %v334_v4 = vld [vmem:[%s462_s0 + $0x8] sm:$0xff]  ;;  %v344_v6 = vld [vmem:[%s462_s0 + $0x38] sm:$0xff] }
   0x3   :  { %v45_v7 = vadd.f32 %v44_v3, %v317_v0  ;;  %v36_v8 = vsel %vm35_vm0, %v334_v4, 0.0  ;;  %v48_v9 = vsel %vm35_vm0, %v344_v6, 0.0  ;;  %v354_v10 = vld [vmem:[%s462_s0 + $0x10] sm:$0xff]  ;;  %v359_v11 = vld [vmem:[%s462_s0 + $0x18] sm:$0xff]  ;;  %v57_v12 = vmul.f32 %v334_v4, %v334_v4  ;;  %v369_v15 = vld [vmem:[%s462_s0 + $0x48] sm:$0xff] }
   0x4   :  { %v37_v13 = vadd.f32 %v36_v8, %v327_v2  ;;  %v40_v14 = vsel %vm35_vm0, %v359_v11, 0.0 }
   0x5   :  { %8 = vsyncpa [#allocation3], 0  ;;  %46 = vadd.xlane.f32.xlu1 %v45_v7  ;;  %v49_v16 = vadd.f32 %v48_v9, %v339_v5  ;;  %v56_v17 = vmul.f32 %v327_v2, %v327_v2  ;;  %v41_v18 = vadd.f32 %v40_v14, %v354_v10  ;;  %v76_v19 = vsel %vm35_vm0, %v57_v12, 0.0  ;;  %v381_v21 = vld [vmem:[%s462_s0 + $0x40] sm:$0xff] }
   0x6   :  { %38 = vadd.xlane.f32.xlu0 %v37_v13  ;;  %v61_v20 = vmul.f32 %v322_v1, %v322_v1  ;;  %v52_v22 = vsel %vm35_vm0, %v369_v15, 0.0  ;;  %v59_v23 = vmul.f32 %v359_v11, %v359_v11  ;;  %v60_v25 = vmul.f32 %v317_v0, %v317_v0 }
   0x7   :  { %v77_v24 = vadd.f32 %v76_v19, %v56_v17  ;;  %v53_v26 = vadd.f32 %v52_v22, %v381_v21  ;;  %v58_v28 = vmul.f32 %v354_v10, %v354_v10  ;;  %v65_v29 = vmul.f32 %v369_v15, %v369_v15 }
   0x8   :  { %v84_v27 = vsel %vm35_vm0, %v61_v20, 0.0  ;;  %v80_v30 = vsel %vm35_vm0, %v59_v23, 0.0  ;;  %v63_v31 = vmul.f32 %v344_v6, %v344_v6  ;;  %v64_v33 = vmul.f32 %v381_v21, %v381_v21 }
   0x9   :  { %50 = vadd.xlane.f32.xlu1 %v49_v16  ;;  %v85_v32 = vadd.f32 %v84_v27, %v60_v25  ;;  %v81_v34 = vadd.f32 %v80_v30, %v58_v28  ;;  %v92_v35 = vsel %vm35_vm0, %v65_v29, 0.0  ;;  %v62_v36 = vmul.f32 %v339_v5, %v339_v5  ;;  %v131_v27 = vld [vmem:[%s463_s1] sm:$0xff]  ;;  %v132_v30 = vld [vmem:[%s463_s1 + $0x8] sm:$0xff] }
   0xa   :  { %42 = vadd.xlane.f32.xlu0 %v41_v18  ;;  %v88_v37 = vsel %vm35_vm0, %v63_v31, 0.0  ;;  %v93_v38 = vadd.f32 %v92_v35, %v64_v33  ;;  %v290_v40 = vmov 0   ;;  %v135_v33 = vld [vmem:[%s463_s1 + $0x20] sm:$0xff]  ;;  %v133_v35 = vld [vmem:[%s463_s1 + $0x10] sm:$0xff] }
   0xb   :  { %v89_v39 = vadd.f32 %v88_v37, %v62_v36  ;;  %256 = vset.pattern.permute.xlu0 %v290_v40  ;;  %257 = vset.pattern.permute.xlu1 %v290_v40 }
   0xd   :  { %78 = vadd.xlane.f32.xlu1 %v77_v24 }
   0xe   :  { %54 = vadd.xlane.f32.xlu0 %v53_v26 }
  0x11   :  { %86 = vadd.xlane.f32.xlu1 %v85_v32 }
  0x12   :  { %82 = vadd.xlane.f32.xlu0 %v81_v34 }
  0x15   :  { %94 = vadd.xlane.f32.xlu1 %v93_v38 }
  0x16   :  { %90 = vadd.xlane.f32.xlu0 %v89_v39  ;;  %v145_v39 = vld [vmem:[%s464_s2 + $0x20] sm:$0xff] }
  0x8e   :  { %v47_v41 = vpop.xlane.xlu1 %46 }
  0x8f   :  { %v39_v42 = vpop.xlane.xlu0 %38  ;;  %v406_v47 = vmul.f32 0.0051020407, %v47_v41 }
  0x90   :  { %v404_v44 = vmul.f32 0.0051020407, %v39_v42  ;;  %v134_v42 = vld [vmem:[%s463_s1 + $0x18] sm:$0xff] }
  0x91   :  { %v108_v54 = vmul.f32 %v406_v47, %v406_v47 }
  0x92   :  { %v51_v43 = vpop.xlane.xlu1 %50  ;;  %v106_v48 = vmul.f32 %v404_v44, %v404_v44 }
  0x93   :  { %v43_v45 = vpop.xlane.xlu0 %42  ;;  %v99_v59 = vmul.f32 0.0051020407, %v51_v43 }
  0x94   :  { %v97_v51 = vmul.f32 0.0051020407, %v43_v45 }
  0x95   :  { %v109_v14 = vmul.f32 %v99_v59, %v99_v59 }
  0x96   :  { %v79_v46 = vpop.xlane.xlu1 %78  ;;  %v107_v60 = vmul.f32 %v97_v51, %v97_v51 }
  0x97   :  { %v101_v49 = vmul.f32 0.0051020407, %v79_v46  ;;  %v55_v50 = vpop.xlane.xlu0 %54 }
  0x98   :  { %v100_v56 = vmul.f32 0.0051020407, %v55_v50 }
  0x99   :  { %v111_v52 = vsub.f32 %v101_v49, %v106_v48  ;;  %v141_v48 = vld [vmem:[%s464_s2] sm:$0xff] }
  0x9a   :  { %v87_v53 = vpop.xlane.xlu1 %86  ;;  %v110_v8 = vmul.f32 %v100_v56, %v100_v56 }
  0x9b   :  { %v116_v55 = vmax.f32 %v111_v52, 0.0  ;;  %v103_v57 = vmul.f32 0.0051020407, %v87_v53  ;;  %v83_v58 = vpop.xlane.xlu0 %82  ;;  %v142_v52 = vld [vmem:[%s464_s2 + $0x8] sm:$0xff] }
  0x9c   :  { %v102_v61 = vmul.f32 0.0051020407, %v83_v58 }
  0x9d   :  { %v121_v62 = vadd.f32 0.001, %v116_v55  ;;  %v113_v63 = vsub.f32 %v103_v57, %v108_v54  ;;  %v143_v55 = vld [vmem:[%s464_s2 + $0x10] sm:$0xff]  ;;  %v144_v57 = vld [vmem:[%s464_s2 + $0x18] sm:$0xff]  ;;  %s291_s2 = smov [#allocation2]  }
  0x9e   :  { %v112_v3 = vsub.f32 %v102_v61, %v107_v60  ;;  %v95_v7 = vpop.xlane.xlu1 %94  ;;  %s241_s23 = sshll.u32 %s291_s2, 4  ;;  %s242_s23 = int_to_ptr.vmem [resolvable:$true] %s241_s23 }
  0x9f   :  { %258 = vrsqrt.f32 %v121_v62  ;;  %v118_v9 = vmax.f32 %v113_v63, 0.0  ;;  %v105_v12 = vmul.f32 0.0051020407, %v95_v7  ;;  %v91_v13 = vpop.xlane.xlu0 %90  ;;  %s268_s24 = scalar_lea.vmem %s242_s23, 1280  ;;  %p273_p1 = scmp.lt.s32.totalorder %s242_s23, %s242_s23 }
  0xa0   :  { %v117_v16 = vmax.f32 %v112_v3, 0.0  ;;  %v104_v17 = vmul.f32 0.0051020407, %v91_v13  ;;  %p269_p0 = scmp.ne.s32.totalorder %s242_s23, %s268_s24  ;;  %p274_p2 = scmp.lt.s32.totalorder %s268_s24, %s268_s24 }
  0xa1   :  { %v115_v18 = vsub.f32 %v105_v12, %v110_v8  ;;  %v123_v19 = vadd.f32 0.001, %v118_v9 }
  0xa2   :  { %v122_v20 = vadd.f32 0.001, %v117_v16  ;;  %v114_v22 = vsub.f32 %v104_v17, %v109_v14  ;;  %p275_p3 = por %p274_p2, %p273_p1 }
  0xa3   :  { %v120_v23 = vmax.f32 %v115_v18, 0.0 }
  0xa4   :  { %260 = vrsqrt.f32 %v122_v20  ;;  %v119_v24 = vmax.f32 %v114_v22, 0.0  ;;  %p276_p4 = pnand %p275_p3, %p269_p0 }
  0xa5   :  { %v125_v25 = vadd.f32 0.001, %v120_v23  ;;  %262 = vrsqrt.f32 %v123_v19 }
  0xa6   :  { %v124_v26 = vadd.f32 0.001, %v119_v24 }
  0xa7   :  { %264 = vrsqrt.f32 %v125_v25 }
  0xa8   :  { %266 = vrsqrt.f32 %v124_v26 }
  0xac   :  { %v259_v28 = vpop.eup %258 }
  0xad   :  { %v136_v29 = vmul.f32 %v259_v28, %v131_v27 }
  0xaf   :  { %158 = vperm.xlu0 %256, %v136_v29   ;;  %v146_v46 = vmul.f32 %v136_v29, %v404_v44 }
  0xb1   :  { %v261_v31 = vpop.eup %260  ;;  %v151_v49 = vsub.f32 %v141_v48, %v146_v46 }
  0xb2   :  { %v137_v32 = vmul.f32 %v261_v31, %v132_v30  ;;  %v263_v34 = vpop.eup %262 }
  0xb3   :  { %v138_v38 = vmul.f32 %v263_v34, %v133_v35 }
  0xb4   :  { %v265_v36 = vpop.eup %264  ;;  %163 = vperm.xlu1 %257, %v137_v32   ;;  %v147_v50 = vmul.f32 %v137_v32, %v97_v51 }
  0xb5   :  { %v140_v37 = vmul.f32 %v265_v36, %v135_v33  ;;  %v267_v40 = vpop.eup %266  ;;  %v148_v54 = vmul.f32 %v138_v38, %v406_v47 }
  0xb6   :  { %v139_v45 = vmul.f32 %v267_v40, %v134_v42  ;;  %v152_v53 = vsub.f32 %v142_v52, %v147_v50 }
  0xb7   :  { %v150_v41 = vmul.f32 %v140_v37, %v100_v56  ;;  %v153_v44 = vsub.f32 %v143_v55, %v148_v54 }
  0xb8   :  { %168 = vperm.xlu1 %257, %v138_v38   ;;  %v149_v56 = vmul.f32 %v139_v45, %v99_v59 }
  0xb9   :  { %v155_v43 = vsub.f32 %v145_v39, %v150_v41 }
  0xba   :  { %v154_v51 = vsub.f32 %v144_v57, %v149_v56 }
  0xbb   :  { %213 = vperm.xlu0 %256, %v155_v43  }
  0xbc   :  { %173 = vperm.xlu1 %257, %v139_v45  }
  0xc0   :  { %178 = vperm.xlu1 %257, %v140_v37  }
  0xc4   :  { %193 = vperm.xlu1 %257, %v151_v49  }
  0xc8   :  { %198 = vperm.xlu1 %257, %v152_v53  }
  0xcc   :  { %203 = vperm.xlu1 %257, %v153_v44  }
  0xd0   :  { %208 = vperm.xlu1 %257, %v154_v51  }
 0x12a   :  { %v159_v62 = vpop.permute.xlu0 %158 }
 0x12b   :  { %v181_v8 = vmul.f32 %v159_v62, %v327_v2  ;;  %v182_v59 = vmul.f32 %v159_v62, %v334_v4 }
 0x12f   :  { %v164_v58 = vpop.permute.xlu1 %163 }
 0x130   :  { %v183_v17 = vmul.f32 %v164_v58, %v354_v10  ;;  %v184_v18 = vmul.f32 %v164_v58, %v359_v11 }
 0x133   :  { %v169_v60 = vpop.permute.xlu1 %168 }
 0x134   :  { %v185_v4 = vmul.f32 %v169_v60, %v317_v0  ;;  %v186_v19 = vmul.f32 %v169_v60, %v322_v1 }
 0x136   :  { %v214_v7 = vpop.permute.xlu0 %213 }
 0x137   :  { %v174_v61 = vpop.permute.xlu1 %173 }
 0x138   :  { %v187_v10 = vmul.f32 %v174_v61, %v339_v5  ;;  %v188_v11 = vmul.f32 %v174_v61, %v344_v6 }
 0x13b   :  { %v179_v63 = vpop.permute.xlu1 %178 }
 0x13c   :  { %v189_v47 = vmul.f32 %v179_v63, %v381_v21  ;;  %v190_v3 = vmul.f32 %v179_v63, %v369_v15 }
 0x13e   :  { %v224_v9 = vadd.f32 %v214_v7, %v189_v47  ;;  %v225_v12 = vadd.f32 %v214_v7, %v190_v3 }
 0x13f   :  { %v194_v13 = vpop.permute.xlu1 %193 }
 0x140   :  { %234 = vst [vmem:[#allocation2 + $0x40] sm:$0xff] %v224_v9  ;;  %235 = vst.msk [vmem:[#allocation2 + $0x48] sm:$0xff] %vm35_vm0, %v225_v12  ;;  %v216_v14 = vadd.f32 %v194_v13, %v181_v8  ;;  %v217_v16 = vadd.f32 %v194_v13, %v182_v59 }
 0x142   :  { %226 = vst [vmem:[#allocation2] sm:$0xff] %v216_v14  ;;  %227 = vst.msk [vmem:[#allocation2 + $0x8] sm:$0xff] %vm35_vm0, %v217_v16 }
 0x143   :  { %v199_v15 = vpop.permute.xlu1 %198 }
 0x144   :  { %v218_v21 = vadd.f32 %v199_v15, %v183_v17  ;;  %v219_v2 = vadd.f32 %v199_v15, %v184_v18 }
 0x146   :  { %228 = vst [vmem:[#allocation2 + $0x10] sm:$0xff] %v218_v21  ;;  %229 = vst.msk [vmem:[#allocation2 + $0x18] sm:$0xff] %vm35_vm0, %v219_v2 }
 0x147   :  { %v204_v20 = vpop.permute.xlu1 %203 }
 0x148   :  { %v220_v22 = vadd.f32 %v204_v20, %v185_v4  ;;  %v221_v23 = vadd.f32 %v204_v20, %v186_v19 }
 0x14a   :  { %230 = vst [vmem:[#allocation2 + $0x20] sm:$0xff] %v220_v22  ;;  %231 = vst.msk [vmem:[#allocation2 + $0x28] sm:$0xff] %vm35_vm0, %v221_v23 }
 0x14b   :  { %v209_v24 = vpop.permute.xlu1 %208 }
 0x14c   :  { %v222_v0 = vadd.f32 %v209_v24, %v187_v10  ;;  %v223_v25 = vadd.f32 %v209_v24, %v188_v11 }
 0x14e   :  { %232 = vst [vmem:[#allocation2 + $0x30] sm:$0xff] %v222_v0  ;;  %233 = vst.msk [vmem:[#allocation2 + $0x38] sm:$0xff] %vm35_vm0, %v223_v25 }
 0x14f   :  { %279 = shalt.err (!%p276_p4)
}
 0x150   :  { %s292_s25 = smov 256   ;;  %s293_s26 = smov 16  }
 0x151   :  { %247 = dma.vmem_to_hbm [thread:$0]  %s242_s23, 1280, %s465_s3, [#allocation3], %s292_s25, %s292_s25, %s293_s26  }
 0x152   :  { %288 = dma.done.wait [#allocation3], 1280  }
 0x153   :  { %289 = vsyncadd [#allocation3], 4294966016 }
 0x154   :  { %251 = vsyncpa [#allocation3], 1 }

</bundles_post_ra>
